<compile_context>
chip_gen: v6e
topology: v6e:2x2x1
jax: 0.10.0
libtpu: 0.0.40
codegen_flags: <defaults>
</compile_context>

<pallas_src>
import functools
import math

import jax
import jax.numpy as jnp
from jax.experimental import pallas as pl
from jax.experimental.pallas import tpu as pltpu


# ----------------------------------------------------------------------------
# Pallas kernel
# ----------------------------------------------------------------------------
def _layernorm_kernel(params_ref, x_ref, o_ref, *, eps: float, d: int):
    # params_ref: (2,) f32 in SMEM -> [alpha, bias]
    # x_ref/o_ref: (row_tile, D) tile in VMEM; reduction along the lane axis.
    x = x_ref[...].astype(jnp.float32)
    mean = jnp.mean(x, axis=-1, keepdims=True)
    diff = x - mean
    # Unbiased variance (ddof = 1), matching torch.Tensor.std's default;
    # guard d == 1 against divide-by-zero in the static denominator.
    inv_ddof = jnp.float32(1.0 / max(d - 1, 1))
    var = jnp.sum(diff * diff, axis=-1, keepdims=True) * inv_ddof
    denom = jnp.sqrt(var) + jnp.float32(eps)      # eps added to the STD, not var
    # Exact f32 divide on the narrow (row_tile, 1) column.  The kernel is
    # HBM-bound, so this VPU work is free; the previous approx-reciprocal +
    # Newton-Raphson path did not meet the 1e-5 accuracy target.
    scale = params_ref[0] / denom                 # fold alpha into per-row scale
    bias = params_ref[1]
    o_ref[...] = (diff * scale + bias).astype(o_ref.dtype)


# ----------------------------------------------------------------------------
# Per-generation VMEM plan & tile-size selection
# ----------------------------------------------------------------------------
def _sublane_pack(dtype) -> int:
    # 8 rows for 4-byte dtypes, 16 for bf16/fp16, 32 for int8/fp8 -> keeps the
    # (sublane, lane) tiles fully packed for the activation dtype.
    return max(8, 32 // jnp.dtype(dtype).itemsize)


def _vmem_plan() -> tuple[int, int]:
    """(tile-selection budget bytes, compiler vmem_limit_bytes) per generation."""
    # Conservative default: safe under v7x's 64 MiB physical VMEM per TC.
    budget, limit = 20 << 20, 44 << 20
    try:
        kind = jax.devices()[0].device_kind.lower()
        if ("v5" in kind) or ("v6" in kind):
            # 128 MiB physical VMEM: much larger tiles are a free win.
            budget, limit = 56 << 20, 100 << 20
    except Exception:
        pass
    return budget, limit


def _choose_row_tile(rows: int, d: int, dtype, vmem_budget_bytes: int) -> int:
    pack = _sublane_pack(dtype)
    itemsize = jnp.dtype(dtype).itemsize
    # Per tile-row VMEM cost: double-buffered input + output tiles in the
    # activation dtype plus ~3 f32-wide temporaries (x_f32, diff, diff*diff).
    per_row = d * (4 * itemsize + 3 * 4)
    tile = max(pack, (vmem_budget_bytes // max(per_row, 1)) // pack * pack)
    # Grid-length floor: when there are enough rows, keep >= ~4 grid steps so
    # both v7x TensorCores stay busy and the software pipeline can overlap
    # DMA / compute / writeback.
    if rows >= 4 * pack:
        tile = min(tile, max(pack, (rows // 4) // pack * pack))
    if rows <= tile:
        # Single block spanning all rows; block == full array dims is legal
        # even when `rows` is not a multiple of the sublane packing.
        tile = rows
    return tile


# ----------------------------------------------------------------------------
# Wrapper
# ----------------------------------------------------------------------------
def layer_normalization(x: jax.Array, alpha: jax.Array, bias: jax.Array,
                        eps: float = 1e-6, *, row_tile: int | None = None,
                        vmem_budget_bytes: int | None = None,
                        vmem_limit_bytes: int | None = None) -> jax.Array:
    """Pallas LayerNormalization over the last axis of x (any leading shape)."""
    orig_shape = x.shape
    d = orig_shape[-1]
    rows = int(math.prod(orig_shape[:-1])) if len(orig_shape) > 1 else 1
    x2 = x.reshape(rows, d)

    plan_budget, plan_limit = _vmem_plan()
    if vmem_budget_bytes is None:
        vmem_budget_bytes = plan_budget
    if vmem_limit_bytes is None:
        vmem_limit_bytes = plan_limit

    if row_tile is None:
        row_tile = _choose_row_tile(rows, d, x.dtype, vmem_budget_bytes)
    if rows <= row_tile:
        row_tile = rows

    # No host-side jnp.pad: the grid uses cdiv and Pallas masks the partial
    # last block (its garbage rows are computed but never written back).
    grid = (pl.cdiv(rows, row_tile),)

    params = jnp.concatenate(
        [jnp.asarray(alpha, jnp.float32).reshape(1),
         jnp.asarray(bias, jnp.float32).reshape(1)])

    kernel = functools.partial(_layernorm_kernel, eps=eps, d=d)
    out = pl.pallas_call(
        kernel,
        out_shape=jax.ShapeDtypeStruct((rows, d), x.dtype),
        grid=grid,
        in_specs=[
            pl.BlockSpec(memory_space=pltpu.MemorySpace.SMEM),   # [alpha, bias]
            pl.BlockSpec((row_tile, d), lambda i: (i, 0)),       # x tile
        ],
        out_specs=pl.BlockSpec((row_tile, d), lambda i: (i, 0)),
        compiler_params=pltpu.CompilerParams(
            dimension_semantics=("parallel",),   # rows split across TCs on v7x
            vmem_limit_bytes=vmem_limit_bytes,
        ),
    )(params, x2)

    return out.reshape(orig_shape)


# ----------------------------------------------------------------------------
# Module-style wrapper mirroring the PyTorch LayerNormalization
# ----------------------------------------------------------------------------
class LayerNormalization:
    def __init__(self, eps: float = 1e-6):
        self.eps = eps
        self.alpha = jnp.ones((1,), dtype=jnp.float32)   # nn.Parameter(ones(1))
        self.bias = jnp.zeros((1,), dtype=jnp.float32)   # nn.Parameter(zeros(1))

    def __call__(self, x):
        return layer_normalization(x, self.alpha, self.bias, self.eps)


# ----------------------------------------------------------------------------
# Pure-JAX reference for verification
# ----------------------------------------------------------------------------
def _layernorm_ref(x, alpha, bias, eps=1e-6):
    mean = jnp.mean(x, axis=-1, keepdims=True)
    std = jnp.std(x, axis=-1, keepdims=True, ddof=1)   # torch unbiased std
    return alpha * (x - mean) / (std + eps) + bias


if __name__ == "__main__":
    key = jax.random.PRNGKey(0)
    k1, k2, k3 = jax.random.split(key, 3)

    ln = LayerNormalization()

    # (1) Small shape consistent with the module: batch=2, seq=8, hidden=32.
    x1 = jax.random.normal(k1, (2, 8, 32), dtype=jnp.float32)
    out1 = jax.block_until_ready(ln(x1))
    ref1 = _layernorm_ref(x1, ln.alpha, ln.bias, ln.eps)
    assert out1.shape == x1.shape
    assert jnp.allclose(out1, ref1, atol=1e-5, rtol=1e-5), float(
        jnp.max(jnp.abs(out1 - ref1)))

    # (2) Lane-dense D=128 with rows (150) not a multiple of the tile (64):
    #     exercises the padless partial-last-block path and a multi-step grid.
    x2 = jax.random.normal(k2, (3, 50, 128), dtype=jnp.float32)
    out2 = jax.block_until_ready(
        layer_normalization(x2, ln.alpha, ln.bias, ln.eps, row_tile=64))
    ref2 = _layernorm_ref(x2, ln.alpha, ln.bias, ln.eps)
    assert out2.shape == x2.shape
    assert jnp.allclose(out2, ref2, atol=1e-5, rtol=1e-5), float(
        jnp.max(jnp.abs(out2 - ref2)))

    # (3) Auto-tiling path: rows >> sublane pack, lane-dense D; exercises the
    #     byte-based tile chooser and the >= 4-step grid floor.
    x3 = jax.random.normal(k3, (8, 128, 128), dtype=jnp.float32)
    out3 = jax.block_until_ready(ln(x3))
    ref3 = _layernorm_ref(x3, ln.alpha, ln.bias, ln.eps)
    assert out3.shape == x3.shape
    assert jnp.allclose(out3, ref3, atol=1e-5, rtol=1e-5), float(
        jnp.max(jnp.abs(out3 - ref3)))

    print("KERNEL_OK")
</pallas_src>

<mosaic_0001>
module attributes {stable_mosaic.version = 11 : i64} {
  func.func @_layernorm_kernel(%arg0: i32, %arg1: memref<2xf32, #tpu.memory_space<smem>>, %arg2: memref<16x32xf32, #tpu.memory_space<vmem>>, %arg3: memref<16x32xf32, #tpu.memory_space<vmem>>) attributes {dimension_semantics = [#tpu.dimension_semantics<parallel>], iteration_bounds = array<i64: 1>, scalar_prefetch = 0 : i64, scratch_operands = 0 : i64, tpu.core_type = #tpu.core_type<tc>, window_params = [{transform_indices = @transform_0, window_bounds = array<i64: 2>}, {transform_indices = @transform_1, window_bounds = array<i64: 16, 32>}, {transform_indices = @transform_2, window_bounds = array<i64: 16, 32>}]} {
    %c0 = arith.constant 0 : index
    %c0_0 = arith.constant 0 : index
    %0 = vector.load %arg2[%c0, %c0_0] : memref<16x32xf32, #tpu.memory_space<vmem>>, vector<16x32xf32>
    %cst = arith.constant dense<0.000000e+00> : vector<16xf32>
    %1 = vector.multi_reduction <add>, %0, %cst [1] : vector<16x32xf32> to vector<16xf32>
    %2 = vector.shape_cast %1 : vector<16xf32> to vector<16x1xf32>
    %cst_1 = arith.constant 3.200000e+01 : f32
    %3 = vector.broadcast %cst_1 : f32 to vector<16x1xf32>
    %4 = arith.divf %2, %3 : vector<16x1xf32>
    %5 = vector.broadcast %4 : vector<16x1xf32> to vector<16x32xf32>
    %6 = arith.subf %0, %5 : vector<16x32xf32>
    %7 = arith.mulf %6, %6 : vector<16x32xf32>
    %cst_2 = arith.constant dense<0.000000e+00> : vector<16xf32>
    %8 = vector.multi_reduction <add>, %7, %cst_2 [1] : vector<16x32xf32> to vector<16xf32>
    %9 = vector.shape_cast %8 : vector<16xf32> to vector<16x1xf32>
    %cst_3 = arith.constant 0.0322580636 : f32
    %10 = vector.broadcast %cst_3 : f32 to vector<16x1xf32>
    %11 = arith.mulf %9, %10 : vector<16x1xf32>
    %12 = math.sqrt %11 : vector<16x1xf32>
    %cst_4 = arith.constant 9.99999997E-7 : f32
    %13 = vector.broadcast %cst_4 : f32 to vector<16x1xf32>
    %14 = arith.addf %12, %13 : vector<16x1xf32>
    %c0_5 = arith.constant 0 : index
    %15 = memref.load %arg1[%c0_5] : memref<2xf32, #tpu.memory_space<smem>>
    %16 = vector.broadcast %15 : f32 to vector<16x1xf32>
    %17 = arith.divf %16, %14 : vector<16x1xf32>
    %c1 = arith.constant 1 : index
    %18 = memref.load %arg1[%c1] : memref<2xf32, #tpu.memory_space<smem>>
    %19 = vector.broadcast %17 : vector<16x1xf32> to vector<16x32xf32>
    %20 = arith.mulf %6, %19 : vector<16x32xf32>
    %21 = vector.broadcast %18 : f32 to vector<16x32xf32>
    %22 = arith.addf %20, %21 : vector<16x32xf32>
    %c0_6 = arith.constant 0 : index
    %c0_7 = arith.constant 0 : index
    %23 = vector.load %arg3[%c0_6, %c0_7] : memref<16x32xf32, #tpu.memory_space<vmem>>, vector<16x32xf32>
    tpu.vector_store %arg3[%c0_6, %c0_7], %22 {strides = array<i32>} : memref<16x32xf32, #tpu.memory_space<vmem>>, vector<16x32xf32>,
    return
  }
  func.func @transform_0(%arg0: i32) -> i32 {
    %c0_i32 = arith.constant 0 : i32
    %c0_i32_0 = arith.constant 0 : i32
    return %c0_i32 : i32
  }
  func.func @transform_1(%arg0: i32) -> (i32, i32) {
    %c0_i32 = arith.constant 0 : i32
    %c0_i32_0 = arith.constant 0 : i32
    return %arg0, %c0_i32 : i32, i32
  }
  func.func @transform_2(%arg0: i32) -> (i32, i32) {
    %c0_i32 = arith.constant 0 : i32
    %c0_i32_0 = arith.constant 0 : i32
    return %arg0, %c0_i32 : i32, i32
  }
}

</mosaic_0001>

<bundles_post_ra>
// kernel: tpu_custom_call.1
= control target key start
LH: loop header
LB: loop body
LE: loop exit
PB: predicated region body
PF: predicated region fallthrough
CT: control target
= control target key end

     0   :  { %7 = vsyncpa [#allocation5], 0  ;;  %s218_s0 = inlined_call_operand.hbm [shape: f32[2], index: 0, kind: input, shape index: {}]   ;;  %s219_s1 = inlined_call_operand.hbm [shape: f32[16,32], index: 1, kind: input, shape index: {}]   ;;  %s220_s2 = inlined_call_operand.hbm [shape: f32[16,32], index: 2, kind: output, shape index: {}]  }
   0x1   :  { %8 = vsyncpa [#allocation3], 0 }
   0x2   :  { %9 = vsyncpa [#allocation4], 0  ;;  %s177_s9 = smov [#allocation2]   ;;  %s178_s12 = smov [#allocation6]  }
   0x3   :  { %17 = dma.hbm_to_smem %s218_s0, 16, %s177_s9, [#allocation5]  }
   0x4   :  { %s23_s13 = sshll.u32 %s178_s12, 4  ;;  %s24_s13 = int_to_ptr.vmem [resolvable:$true] %s23_s13 }
   0x5   :  { %s139_s14 = scalar_lea.vmem %s24_s13, 256  ;;  %p144_p1 = scmp.lt.s32.totalorder %s24_s13, %s24_s13 }
   0x6   :  { %p140_p0 = scmp.ne.s32.totalorder %s24_s13, %s139_s14  ;;  %p145_p2 = scmp.lt.s32.totalorder %s139_s14, %s139_s14 }
   0x8   :  { %p146_p3 = por %p145_p2, %p144_p1 }
   0xa   :  { %p147_p4 = pnand %p146_p3, %p140_p0 }
   0xc   :  { %150 = shalt.err (!%p147_p4)
}
   0xd   :  { %s179_s15 = smov 128   ;;  %s180_s16 = smov 8  }
   0xe   :  { %29 = dma.hbm_to_vmem [thread:$0]  %s219_s1, 256, %s24_s13, [#allocation3], %s179_s15, %s179_s15, %s180_s16  }
   0xf   :  { %171 = dma.done.wait [#allocation5], 16  }
  0x10   :  { %172 = vsyncadd [#allocation5], 4294967280 }
  0x11   :  { %173 = dma.done.wait [#allocation3], 256  }
  0x12   :  { %174 = vsyncadd [#allocation3], 4294967040 }
  0x13   :  { %36 = sfence }
  0x14   :  { %v37_v0 = vld [vmem:[#allocation6] sm:$0xff]  ;;  %vm39_vm0 = vcmask 261120   ;;  %v38_v1 = vld [vmem:[#allocation6 + $0x8] sm:$0xff]  ;;  %s77_s0 = sld [smem:[#allocation2]]  ;;  %s181_s19 = smov [#allocation7]  }
  0x15   :  { %v40_v2 = vsel %vm39_vm0, %v37_v0, 0.0  ;;  %v43_v3 = vsel %vm39_vm0, %v38_v1, 0.0  ;;  %s109_s1 = sld [smem:[#allocation2 + $0x1]]  ;;  %s96_s20 = sshll.u32 %s181_s19, 4  ;;  %s97_s20 = int_to_ptr.vmem [resolvable:$true] %s96_s20 }
  0x16   :  { %41 = vadd.xlane.f32.xlu0 %v40_v2  ;;  %s151_s21 = scalar_lea.vmem %s97_s20, 256  ;;  %p156_p6 = scmp.lt.s32.totalorder %s97_s20, %s97_s20 }
  0x17   :  { %p152_p5 = scmp.ne.s32.totalorder %s97_s20, %s151_s21  ;;  %p157_p7 = scmp.lt.s32.totalorder %s151_s21, %s151_s21 }
  0x19   :  { %p158_p8 = por %p157_p7, %p156_p6 }
  0x1a   :  { %44 = vadd.xlane.f32.xlu0 %v43_v3  ;;  %v78_v30 = vstv %s77_s0 }
  0x1b   :  { %v86_v33 = vstv %s109_s1  ;;  %p159_p9 = pnand %p158_p8, %p152_p5 }
  0x9f   :  { %v42_v4 = vpop.xlane.xlu0 %41 }
  0xa0   :  { %v47_v5 = vmul.f32 0.03125, %v42_v4 }
  0xa2   :  { %v49_v6 = vsub.f32 %v37_v0, %v47_v5 }
  0xa3   :  { %v45_v7 = vpop.xlane.xlu0 %44 }
  0xa4   :  { %v48_v8 = vmul.f32 0.03125, %v45_v7  ;;  %v51_v9 = vmul.f32 %v49_v6, %v49_v6 }
  0xa6   :  { %v50_v10 = vsub.f32 %v38_v1, %v48_v8  ;;  %v53_v11 = vsel %vm39_vm0, %v51_v9, 0.0 }
  0xa7   :  { %54 = vadd.xlane.f32.xlu1 %v53_v11 }
  0xa8   :  { %v52_v12 = vmul.f32 %v50_v10, %v50_v10 }
  0xaa   :  { %v56_v13 = vsel %vm39_vm0, %v52_v12, 0.0 }
  0xab   :  { %57 = vadd.xlane.f32.xlu1 %v56_v13 }
 0x130   :  { %v55_v14 = vpop.xlane.xlu1 %54 }
 0x131   :  { %v59_v15 = vmul.f32 0.032258064, %v55_v14 }
 0x133   :  { %115 = vrsqrt.f32 %v59_v15  ;;  %vm63_vm1 = vcmp.eq.f32.partialorder %v59_v15, inf  ;;  %v66_v20 = vand.u32 2147483648, %v59_v15  ;;  %vm65_vm2 = vcmp.eq.f32.partialorder %v59_v15, 0.0 }
 0x134   :  { %v58_v16 = vpop.xlane.xlu1 %57 }
 0x135   :  { %v60_v17 = vmul.f32 0.032258064, %v58_v16 }
 0x137   :  { %117 = vrsqrt.f32 %v60_v17  ;;  %vm70_vm3 = vcmp.eq.f32.partialorder %v60_v17, inf  ;;  %v73_v26 = vand.u32 2147483648, %v60_v17  ;;  %vm72_vm4 = vcmp.eq.f32.partialorder %v60_v17, 0.0 }
 0x140   :  { %v116_v18 = vpop.eup %115 }
 0x141   :  { %v62_v19 = vmul.f32 %v116_v18, %v59_v15 }
 0x143   :  { %v64_v21 = vsel %vm63_vm1, %v59_v15, %v62_v19 }
 0x144   :  { %v118_v22 = vpop.eup %117  ;;  %v67_v23 = vsel %vm65_vm2, %v66_v20, %v64_v21 }
 0x145   :  { %v75_v24 = vadd.f32 1e-06, %v67_v23  ;;  %v69_v25 = vmul.f32 %v118_v22, %v60_v17 }
 0x147   :  { %119 = vrcp.f32 %v75_v24  ;;  %v71_v27 = vsel %vm70_vm3, %v60_v17, %v69_v25 }
 0x148   :  { %v74_v28 = vsel %vm72_vm4, %v73_v26, %v71_v27 }
 0x149   :  { %v76_v29 = vadd.f32 1e-06, %v74_v28 }
 0x14b   :  { %121 = vrcp.f32 %v76_v29 }
 0x154   :  { %v120_v31 = vpop.eup %119 }
 0x155   :  { %v80_v32 = vmul.f32 %v120_v31, %v78_v30 }
 0x157   :  { %v84_v34 = vmul.f32 %v80_v32, %v49_v6 }
 0x158   :  { %v122_v35 = vpop.eup %121 }
 0x159   :  { %v82_v36 = vmul.f32 %v122_v35, %v78_v30  ;;  %v87_v37 = vadd.f32 %v86_v33, %v84_v34 }
 0x15b   :  { %v85_v38 = vmul.f32 %v82_v36, %v50_v10  ;;  %89 = vst.msk [vmem:[#allocation7] sm:$0xff] %vm39_vm0, %v87_v37 }
 0x15d   :  { %v88_v39 = vadd.f32 %v86_v33, %v85_v38 }
 0x15f   :  { %90 = vst.msk [vmem:[#allocation7 + $0x8] sm:$0xff] %vm39_vm0, %v88_v39 }
 0x160   :  { %162 = shalt.err (!%p159_p9)
}
 0x161   :  { %102 = dma.vmem_to_hbm [thread:$0]  %s97_s20, 256, %s220_s2, [#allocation4], %s179_s15, %s179_s15, %s180_s16  }
 0x162   :  { %175 = dma.done.wait [#allocation4], 256  }
 0x163   :  { %176 = vsyncadd [#allocation4], 4294967040 }
 0x164   :  { %106 = vsyncpa [#allocation3], 1 }
 0x165   :  { %107 = vsyncpa [#allocation4], 1 }
 0x166   :  { %108 = vsyncpa [#allocation5], 1 }

</bundles_post_ra>
